<compile_context>
chip_gen: v5e
topology: v5e:2x2
jax: 0.10.0
libtpu: 0.0.40
codegen_flags: <defaults>
</compile_context>

<pallas_src>
import functools

import jax
import jax.numpy as jnp
from jax.experimental import pallas as pl
from jax.experimental.pallas import tpu as pltpu

LANES = 128
MAX_BLOCK_ROWS = 2048   # f32 tile = 1 MiB; 2 inputs x 2 buffers = 4 MiB VMEM
NUM_SPLITS = 2          # leading "parallel" grid axis (maps to 2 TCs on v7x)


def _dice_partial_sums_kernel(x_ref, t_ref, inter_ref, denom_ref, *,
                              rows, block_rows, steps_per_split, num_splits):
    """Streaming partial sums for dice loss.

    x_ref, t_ref         : (block_rows, 128) input tiles (any dtype, upcast to f32)
    inter_ref, denom_ref : (8, 128) f32 output blocks; resident across the inner
                           ("arbitrary") grid axis, one block per split -> they
                           act as per-core accumulators.
    """
    c = pl.program_id(0)   # split index ("parallel", one per TensorCore on v7x)
    i = pl.program_id(1)   # streaming step within the split ("arbitrary")

    @pl.when(i == 0)
    def _init():
        inter_ref[...] = jnp.zeros_like(inter_ref)
        denom_ref[...] = jnp.zeros_like(denom_ref)

    def _accumulate(masked):
        xf = x_ref[...].astype(jnp.float32)
        s = 1.0 / (1.0 + jnp.exp(-xf))          # sigmoid: exp on EUP + divide
        t = t_ref[...].astype(jnp.float32)
        if masked:
            # Logical (unclamped) block index -> number of valid rows this step.
            blk = c * steps_per_split + i
            valid = rows - blk * block_rows      # may be <= 0 on padding steps
            ridx = jax.lax.broadcasted_iota(jnp.int32, x_ref.shape, 0)
            keep = ridx < valid
            # jnp.where (not multiply) so undefined tail data can never leak in.
            s = jnp.where(keep, s, 0.0)
            t = jnp.where(keep, t, 0.0)
        # Fold the (block_rows,128) tile into one vreg-shaped (8,128) partial:
        # pure VPU adds across sublane groups (no XLU), tiny accumulator RMW.
        inter_ref[...] += (s * t).reshape(-1, 8, LANES).sum(axis=0)
        denom_ref[...] += (s + t).reshape(-1, 8, LANES).sum(axis=0)

    nblocks = pl.cdiv(rows, block_rows)
    first_non_full = rows // block_rows                       # static
    i_mask_start = first_non_full - (num_splits - 1) * steps_per_split
    needs_mask = (rows % block_rows != 0) or (num_splits * steps_per_split != nblocks)

    if not needs_mask:
        _accumulate(False)
    else:
        # Only the last split can see a partial or empty (padding) block.
        guaranteed_full = jnp.logical_or(c < num_splits - 1, i < i_mask_start)

        @pl.when(guaranteed_full)
        def _full():
            _accumulate(False)

        @pl.when(jnp.logical_not(guaranteed_full))
        def _tail():
            _accumulate(True)


def dice_loss(inputs, targets, smooth=1.0, *, max_block_rows=MAX_BLOCK_ROWS):
    """JAX/Pallas equivalent of DiceLoss.forward(inputs, targets, smooth)."""
    x = inputs.reshape(-1)   # row-major flatten == torch .view(-1)
    t = targets.reshape(-1)
    n = x.shape[0]

    lane_tail = n % LANES
    n_main = n - lane_tail
    rows = n_main // LANES

    use_kernel = rows >= 8
    if not use_kernel:
        # Sub-(8,128) leftovers: not worth a kernel launch; fold below.
        n_main = 0
        lane_tail = n

    intersection = jnp.float32(0.0)
    denom = jnp.float32(0.0)

    if use_kernel:
        # Lane-aligned inputs stream with zero extra copies; otherwise only the
        # main prefix is materialized (the <128-element tail is handled below).
        x_main = x if lane_tail == 0 else x[:n_main]
        t_main = t if lane_tail == 0 else t[:n_main]
        x2 = x_main.reshape(rows, LANES)
        t2 = t_main.reshape(rows, LANES)

        block_rows = min(max_block_rows, (rows // 8) * 8)   # multiple of 8, <= rows
        nblocks = pl.cdiv(rows, block_rows)
        num_splits = NUM_SPLITS if nblocks >= NUM_SPLITS else 1
        sps = pl.cdiv(nblocks, num_splits)                   # steps per split

        kernel = functools.partial(
            _dice_partial_sums_kernel,
            rows=rows, block_rows=block_rows,
            steps_per_split=sps, num_splits=num_splits)

        def in_map(c, i):
            # Clamp so padding steps (when nblocks % num_splits != 0) re-read the
            # last in-bounds block; the in-kernel mask zeroes their contribution.
            return (jnp.minimum(c * sps + i, nblocks - 1), 0)

        tile_spec = pl.BlockSpec((block_rows, LANES), in_map)
        acc_spec = pl.BlockSpec((None, 8, LANES), lambda c, i: (c, 0, 0))
        acc_shape = jax.ShapeDtypeStruct((num_splits, 8, LANES), jnp.float32)

        bytes_accessed = int(x2.size * x2.dtype.itemsize
                             + t2.size * t2.dtype.itemsize
                             + 2 * num_splits * 8 * LANES * 4)
        cost = pl.CostEstimate(flops=int(10 * rows * LANES),
                               transcendentals=int(rows * LANES),
                               bytes_accessed=bytes_accessed)

        inter_p, denom_p = pl.pallas_call(
            kernel,
            out_shape=(acc_shape, acc_shape),
            grid_spec=pltpu.PrefetchScalarGridSpec(
                num_scalar_prefetch=0,
                grid=(num_splits, sps),
                in_specs=[tile_spec, tile_spec],
                out_specs=(acc_spec, acc_spec),
            ),
            compiler_params=pltpu.CompilerParams(
                dimension_semantics=("parallel", "arbitrary")),
            cost_estimate=cost,
        )(x2, t2)

        intersection = jnp.sum(inter_p)
        denom = jnp.sum(denom_p)

    if lane_tail:
        # Ragged (<128-element) tail: tiny plain-JAX epilogue, no full-copy pad.
        xt = jax.nn.sigmoid(x[n_main:].astype(jnp.float32))
        tt = t[n_main:].astype(jnp.float32)
        intersection = intersection + jnp.sum(xt * tt)
        denom = denom + jnp.sum(xt) + jnp.sum(tt)

    dice = (2.0 * intersection + smooth) / (denom + smooth)
    return 1.0 - dice


def dice_loss_ref(inputs, targets, smooth=1.0):
    """Pure-JAX reference mirroring the PyTorch module."""
    x = jax.nn.sigmoid(inputs.astype(jnp.float32)).reshape(-1)
    t = targets.astype(jnp.float32).reshape(-1)
    inter = jnp.sum(x * t)
    dice = (2.0 * inter + smooth) / (jnp.sum(x) + jnp.sum(t) + smooth)
    return 1.0 - dice


if __name__ == "__main__":
    key = jax.random.PRNGKey(0)
    k1, k2, k3, k4, k5, k6 = jax.random.split(key, 6)

    # Small NCHW segmentation-style shapes: batch=2, channels=4, spatial=16x16.
    B, C, H, W = 2, 4, 16, 16
    logits = jax.random.normal(k1, (B, C, H, W), dtype=jnp.float32)
    masks = (jax.random.uniform(k2, (B, C, H, W)) > 0.5).astype(jnp.float32)

    loss = jax.block_until_ready(dice_loss(logits, masks, smooth=1.0))
    ref = dice_loss_ref(logits, masks, smooth=1.0)
    assert jnp.allclose(loss, ref, rtol=1e-5, atol=1e-5), (loss, ref)

    # Regression: lane-unaligned flat length (ragged tail) + partial row block.
    logits2 = jax.random.normal(k3, (3, 5, 7, 11), dtype=jnp.float32)
    masks2 = (jax.random.uniform(k4, (3, 5, 7, 11)) > 0.5).astype(jnp.float32)
    loss2 = jax.block_until_ready(dice_loss(logits2, masks2, smooth=1.0))
    ref2 = dice_loss_ref(logits2, masks2, smooth=1.0)
    assert jnp.allclose(loss2, ref2, rtol=1e-5, atol=1e-5), (loss2, ref2)

    # Regression: multi-block grid with even 2-way split (no masking needed).
    loss3 = jax.block_until_ready(dice_loss(logits, masks, smooth=1.0, max_block_rows=8))
    assert jnp.allclose(loss3, ref, rtol=1e-5, atol=1e-5), (loss3, ref)

    # Regression: odd block count -> clamped/empty padding step on split 1.
    vec_x = jax.random.normal(k5, (2565,), dtype=jnp.float32)
    vec_t = (jax.random.uniform(k6, (2565,)) > 0.5).astype(jnp.float32)
    loss4 = jax.block_until_ready(dice_loss(vec_x, vec_t, smooth=1.0, max_block_rows=8))
    ref4 = dice_loss_ref(vec_x, vec_t, smooth=1.0)
    assert jnp.allclose(loss4, ref4, rtol=1e-5, atol=1e-5), (loss4, ref4)

    print("KERNEL_OK")
</pallas_src>

<mosaic_0001>
module attributes {stable_mosaic.version = 11 : i64} {
  func.func @_dice_partial_sums_kernel(%arg0: i32, %arg1: i32, %arg2: memref<16x128xf32, #tpu.memory_space<vmem>>, %arg3: memref<16x128xf32, #tpu.memory_space<vmem>>, %arg4: memref<1x8x128xf32, #tpu.memory_space<vmem>>, %arg5: memref<1x8x128xf32, #tpu.memory_space<vmem>>) attributes {dimension_semantics = [#tpu.dimension_semantics<parallel>, #tpu.dimension_semantics<arbitrary>], iteration_bounds = array<i64: 1, 1>, scalar_prefetch = 0 : i64, scratch_operands = 0 : i64, tpu.core_type = #tpu.core_type<tc>, window_params = [{transform_indices = @transform_0, window_bounds = array<i64: 16, 128>}, {transform_indices = @transform_1, window_bounds = array<i64: 16, 128>}, {transform_indices = @transform_2, window_bounds = array<i64: 1, 8, 128>}, {transform_indices = @transform_3, window_bounds = array<i64: 1, 8, 128>}]} {
    %c0_i32 = arith.constant 0 : i32
    %0 = arith.cmpi eq, %arg1, %c0_i32 : i32
    %1 = arith.extui %0 : i1 to i32
    %c0_i32_0 = arith.constant 0 : i32
    %2 = arith.cmpi ne, %1, %c0_i32_0 : i32
    scf.if %2 {
      %cst_20 = arith.constant 0.000000e+00 : f32
      %30 = vector.broadcast %cst_20 : f32 to vector<8x128xf32>
      %c0_21 = arith.constant 0 : index
      %c0_22 = arith.constant 0 : index
      %c0_23 = arith.constant 0 : index
      %31 = vector.load %arg4[%c0_21, %c0_22, %c0_23] : memref<1x8x128xf32, #tpu.memory_space<vmem>>, vector<1x8x128xf32>
      %32 = vector.shape_cast %31 : vector<1x8x128xf32> to vector<8x128xf32>
      %33 = vector.shape_cast %30 : vector<8x128xf32> to vector<1x8x128xf32>
      tpu.vector_store %arg4[%c0_21, %c0_22, %c0_23], %33 {strides = array<i32>} : memref<1x8x128xf32, #tpu.memory_space<vmem>>, vector<1x8x128xf32>,
      %cst_24 = arith.constant 0.000000e+00 : f32
      %34 = vector.broadcast %cst_24 : f32 to vector<8x128xf32>
      %c0_25 = arith.constant 0 : index
      %c0_26 = arith.constant 0 : index
      %c0_27 = arith.constant 0 : index
      %35 = vector.load %arg5[%c0_25, %c0_26, %c0_27] : memref<1x8x128xf32, #tpu.memory_space<vmem>>, vector<1x8x128xf32>
      %36 = vector.shape_cast %35 : vector<1x8x128xf32> to vector<8x128xf32>
      %37 = vector.shape_cast %34 : vector<8x128xf32> to vector<1x8x128xf32>
      tpu.vector_store %arg5[%c0_25, %c0_26, %c0_27], %37 {strides = array<i32>} : memref<1x8x128xf32, #tpu.memory_space<vmem>>, vector<1x8x128xf32>,
    } else {
    }
    %c0 = arith.constant 0 : index
    %c0_1 = arith.constant 0 : index
    %3 = vector.load %arg2[%c0, %c0_1] : memref<16x128xf32, #tpu.memory_space<vmem>>, vector<16x128xf32>
    %cst = arith.constant 0.000000e+00 : f32
    %4 = vector.broadcast %cst : f32 to vector<16x128xf32>
    %5 = arith.subf %4, %3 : vector<16x128xf32>
    %6 = math.exp %5 : vector<16x128xf32>
    %cst_2 = arith.constant 1.000000e+00 : f32
    %7 = vector.broadcast %cst_2 : f32 to vector<16x128xf32>
    %8 = arith.addf %7, %6 : vector<16x128xf32>
    %cst_3 = arith.constant 1.000000e+00 : f32
    %9 = vector.broadcast %cst_3 : f32 to vector<16x128xf32>
    %10 = arith.divf %9, %8 : vector<16x128xf32>
    %c0_4 = arith.constant 0 : index
    %c0_5 = arith.constant 0 : index
    %11 = vector.load %arg3[%c0_4, %c0_5] : memref<16x128xf32, #tpu.memory_space<vmem>>, vector<16x128xf32>
    %c0_6 = arith.constant 0 : index
    %c0_7 = arith.constant 0 : index
    %c0_8 = arith.constant 0 : index
    %12 = vector.load %arg4[%c0_6, %c0_7, %c0_8] : memref<1x8x128xf32, #tpu.memory_space<vmem>>, vector<1x8x128xf32>
    %13 = vector.shape_cast %12 : vector<1x8x128xf32> to vector<8x128xf32>
    %14 = arith.mulf %10, %11 : vector<16x128xf32>
    %15 = vector.shape_cast %14 : vector<16x128xf32> to vector<2x8x128xf32>
    %cst_9 = arith.constant dense<0.000000e+00> : vector<8x128xf32>
    %16 = vector.multi_reduction <add>, %15, %cst_9 [0] : vector<2x8x128xf32> to vector<8x128xf32>
    %17 = arith.addf %13, %16 : vector<8x128xf32>
    %c0_10 = arith.constant 0 : index
    %c0_11 = arith.constant 0 : index
    %c0_12 = arith.constant 0 : index
    %18 = vector.load %arg4[%c0_10, %c0_11, %c0_12] : memref<1x8x128xf32, #tpu.memory_space<vmem>>, vector<1x8x128xf32>
    %19 = vector.shape_cast %18 : vector<1x8x128xf32> to vector<8x128xf32>
    %20 = vector.shape_cast %17 : vector<8x128xf32> to vector<1x8x128xf32>
    tpu.vector_store %arg4[%c0_10, %c0_11, %c0_12], %20 {strides = array<i32>} : memref<1x8x128xf32, #tpu.memory_space<vmem>>, vector<1x8x128xf32>,
    %c0_13 = arith.constant 0 : index
    %c0_14 = arith.constant 0 : index
    %c0_15 = arith.constant 0 : index
    %21 = vector.load %arg5[%c0_13, %c0_14, %c0_15] : memref<1x8x128xf32, #tpu.memory_space<vmem>>, vector<1x8x128xf32>
    %22 = vector.shape_cast %21 : vector<1x8x128xf32> to vector<8x128xf32>
    %23 = arith.addf %10, %11 : vector<16x128xf32>
    %24 = vector.shape_cast %23 : vector<16x128xf32> to vector<2x8x128xf32>
    %cst_16 = arith.constant dense<0.000000e+00> : vector<8x128xf32>
    %25 = vector.multi_reduction <add>, %24, %cst_16 [0] : vector<2x8x128xf32> to vector<8x128xf32>
    %26 = arith.addf %22, %25 : vector<8x128xf32>
    %c0_17 = arith.constant 0 : index
    %c0_18 = arith.constant 0 : index
    %c0_19 = arith.constant 0 : index
    %27 = vector.load %arg5[%c0_17, %c0_18, %c0_19] : memref<1x8x128xf32, #tpu.memory_space<vmem>>, vector<1x8x128xf32>
    %28 = vector.shape_cast %27 : vector<1x8x128xf32> to vector<8x128xf32>
    %29 = vector.shape_cast %26 : vector<8x128xf32> to vector<1x8x128xf32>
    tpu.vector_store %arg5[%c0_17, %c0_18, %c0_19], %29 {strides = array<i32>} : memref<1x8x128xf32, #tpu.memory_space<vmem>>, vector<1x8x128xf32>,
    return
  }
  func.func @transform_0(%arg0: i32, %arg1: i32) -> (i32, i32) {
    %c1_i32 = arith.constant 1 : i32
    %0 = arith.muli %arg0, %c1_i32 : i32
    %1 = arith.addi %0, %arg1 : i32
    %c0_i32 = arith.constant 0 : i32
    %2 = arith.minsi %1, %c0_i32 : i32
    %c0_i32_0 = arith.constant 0 : i32
    %c0_i32_1 = arith.constant 0 : i32
    return %2, %c0_i32_0 : i32, i32
  }
  func.func @transform_1(%arg0: i32, %arg1: i32) -> (i32, i32) {
    %c1_i32 = arith.constant 1 : i32
    %0 = arith.muli %arg0, %c1_i32 : i32
    %1 = arith.addi %0, %arg1 : i32
    %c0_i32 = arith.constant 0 : i32
    %2 = arith.minsi %1, %c0_i32 : i32
    %c0_i32_0 = arith.constant 0 : i32
    %c0_i32_1 = arith.constant 0 : i32
    return %2, %c0_i32_0 : i32, i32
  }
  func.func @transform_2(%arg0: i32, %arg1: i32) -> (i32, i32, i32) {
    %c0_i32 = arith.constant 0 : i32
    %c0_i32_0 = arith.constant 0 : i32
    %c0_i32_1 = arith.constant 0 : i32
    return %arg0, %c0_i32, %c0_i32_0 : i32, i32, i32
  }
  func.func @transform_3(%arg0: i32, %arg1: i32) -> (i32, i32, i32) {
    %c0_i32 = arith.constant 0 : i32
    %c0_i32_0 = arith.constant 0 : i32
    %c0_i32_1 = arith.constant 0 : i32
    return %arg0, %c0_i32, %c0_i32_0 : i32, i32, i32
  }
}

</mosaic_0001>

<bundles_post_ra>
// kernel: tpu_custom_call.1
= control target key start
LH: loop header
LB: loop body
LE: loop exit
PB: predicated region body
PF: predicated region fallthrough
CT: control target
= control target key end

     0   :  { %9 = vsyncpa [#allocation3], 0  ;;  %s322_s0 = inlined_call_operand.hbm [shape: f32[16,128], index: 0, kind: input, shape index: {}]   ;;  %s323_s1 = inlined_call_operand.hbm [shape: f32[16,128], index: 1, kind: input, shape index: {}]   ;;  %s324_s2 = inlined_call_operand.hbm [shape: f32[1,8,128], index: 2, kind: output, shape index: {0}]   ;;  %s325_s3 = inlined_call_operand.hbm [shape: f32[1,8,128], index: 3, kind: output, shape index: {1}]  }
   0x1   :  { %10 = vsyncpa [#allocation6], 0 }
   0x2   :  { %11 = vsyncpa [#allocation4], 0 }
   0x3   :  { %12 = vsyncpa [#allocation9], 0  ;;  %s23_s14 = sshll.u32 %s322_s0, 4  ;;  %s284_s15 = smov [#allocation2]   ;;  %s24_s14 = int_to_ptr.hbm [resolvable:$true] %s23_s14 }
   0x4   :  { %s25_s16 = sshll.u32 %s284_s15, 4  ;;  %s42_s19 = sshll.u32 %s323_s1, 4  ;;  %s26_s16 = int_to_ptr.vmem [resolvable:$true] %s25_s16  ;;  %s43_s19 = int_to_ptr.hbm [resolvable:$true] %s42_s19 }
   0x5   :  { %s285_s20 = smov 128   ;;  %s286_s21 = smov 8  }
   0x6   :  { %31 = dma.hbm_to_vmem [thread:$0]  %s24_s14, 256, %s26_s16, [#allocation3], %s285_s20, %s285_s20, %s286_s21  }
   0x7   :  { %s287_s22 = smov [#allocation5]  }
   0x8   :  { %s44_s23 = sshll.u32 %s287_s22, 4  ;;  %s45_s23 = int_to_ptr.vmem [resolvable:$true] %s44_s23 }
   0x9   :  { %50 = dma.hbm_to_vmem [thread:$0]  %s43_s19, 256, %s45_s23, [#allocation6], %s285_s20, %s285_s20, %s286_s21  }
   0xa   :  { %276 = dma.done.wait [#allocation3], 256  }
   0xb   :  { %277 = vsyncadd [#allocation3], 4294967040 }
   0xc   :  { %278 = dma.done.wait [#allocation6], 256  }
   0xd   :  { %279 = vsyncadd [#allocation6], 4294967040  ;;  %v73_v0 = vld [vmem:[#allocation2] sm:$0xff]  ;;  %v74_v1 = vld [vmem:[#allocation2 + $0x8] sm:$0xff]  ;;  %s288_s0 = smov [#allocation7]   ;;  %s134_s26 = sshll.u32 %s324_s2, 4  ;;  %s135_s26 = int_to_ptr.hbm [resolvable:$true] %s134_s26 }
   0xe   :  { %v75_v2 = vsub.f32 0.0, %v73_v0  ;;  %v76_v3 = vsub.f32 0.0, %v74_v1  ;;  %v113_v26 = vld [vmem:[#allocation5] sm:$0xff]  ;;  %v114_v28 = vld [vmem:[#allocation5 + $0x8] sm:$0xff]  ;;  %s132_s1 = sshll.u32 %s288_s0, 4  ;;  %s289_s27 = smov [#allocation8]   ;;  %s133_s1 = int_to_ptr.vmem [resolvable:$true] %s132_s1 }
   0xf   :  { %s143_s28 = sshll.u32 %s289_s27, 4  ;;  %s145_s4 = sshll.u32 %s325_s3, 4  ;;  %s144_s28 = int_to_ptr.vmem [resolvable:$true] %s143_s28  ;;  %s146_s4 = int_to_ptr.hbm [resolvable:$true] %s145_s4 }
  0x10   :  { %v77_v4 = vmul.f32 1.442695, %v75_v2  ;;  %v79_v5 = vmul.f32 1.442695, %v76_v3 }
  0x12   :  { %172 = vpow2.f32 %v77_v4 }
  0x13   :  { %174 = vpow2.f32 %v79_v5 }
  0x18   :  { %v173_v6 = vpop.eup %172 }
  0x19   :  { %v175_v7 = vpop.eup %174  ;;  %v81_v8 = vadd.f32 1.0, %v173_v6 }
  0x1a   :  { %v82_v9 = vadd.f32 1.0, %v175_v7 }
  0x1b   :  { %176 = vrcp.f32 %v81_v8  ;;  %vm88_vm0 = vweird.f32 %v81_v8  ;;  %v94_v13 = vand.u32 2147483648, %v81_v8  ;;  %v92_v16 = vand.u32 2147483647, %v81_v8 }
  0x1c   :  { %178 = vrcp.f32 %v82_v9  ;;  %v109_v17 = vand.u32 2147483648, %v82_v9  ;;  %vm103_vm2 = vweird.f32 %v82_v9  ;;  %v107_v19 = vand.u32 2147483647, %v82_v9 }
  0x1d   :  { %v95_v21 = vor.u32 1.1754944e-38, %v94_v13  ;;  %vm93_vm5 = vcmp.eq.f32.partialorder %v92_v16, 8.507059e+37 }
  0x1e   :  { %v110_v24 = vor.u32 1.1754944e-38, %v109_v17  ;;  %vm108_vm7 = vcmp.eq.f32.partialorder %v107_v19, 8.507059e+37 }
  0x21   :  { %v177_v10 = vpop.eup %176 }
  0x22   :  { %v179_v11 = vpop.eup %178  ;;  %v84_v12 = vmul.f32 %v177_v10, %v81_v8  ;;  %vm89_vm1 = vweird.f32 %v177_v10 }
  0x23   :  { %v99_v14 = vmul.f32 %v179_v11, %v82_v9  ;;  %vm104_vm3 = vweird.f32 %v179_v11  ;;  %vm90_vm4 = vmor %vm88_vm0, %vm89_vm1 }
  0x24   :  { %v85_v15 = vsub.f32 1.0, %v84_v12  ;;  %vm105_vm6 = vmor %vm103_vm2, %vm104_vm3 }
  0x25   :  { %v100_v18 = vsub.f32 1.0, %v99_v14 }
  0x26   :  { %v86_v20 = vmul.f32 %v177_v10, %v85_v15 }
  0x27   :  { %v101_v22 = vmul.f32 %v179_v11, %v100_v18 }
  0x28   :  { %v87_v23 = vadd.f32 %v177_v10, %v86_v20 }
  0x29   :  { %v102_v25 = vadd.f32 %v179_v11, %v101_v22 }
  0x2a   :  { %v91_v27 = vsel %vm90_vm4, %v177_v10, %v87_v23 }
  0x2b   :  { %v96_v29 = vsel %vm93_vm5, %v95_v21, %v91_v27  ;;  %v106_v30 = vsel %vm105_vm6, %v179_v11, %v102_v25 }
  0x2c   :  { %v111_v31 = vsel %vm108_vm7, %v110_v24, %v106_v30  ;;  %v116_v32 = vmul.f32 %v113_v26, %v96_v29  ;;  %v122_v33 = vadd.f32 %v113_v26, %v96_v29 }
  0x2d   :  { %v117_v34 = vmul.f32 %v114_v28, %v111_v31  ;;  %v123_v35 = vadd.f32 %v114_v28, %v111_v31 }
  0x2f   :  { %v118_v36 = vadd.f32 %v117_v34, %v116_v32  ;;  %v124_v37 = vadd.f32 %v123_v35, %v122_v33 }
  0x31   :  { %120 = vst [vmem:[#allocation7] sm:$0xff] %v118_v36 }
  0x32   :  { %126 = vst [vmem:[#allocation8] sm:$0xff] %v124_v37  ;;  %137 = dma.vmem_to_hbm [thread:$0]  %s133_s1, 128, %s135_s26, [#allocation4]  }
  0x33   :  { %148 = dma.vmem_to_hbm [thread:$0]  %s144_s28, 128, %s146_s4, [#allocation9]  }
  0x34   :  { %280 = dma.done.wait [#allocation4], 128  }
  0x35   :  { %281 = vsyncadd [#allocation4], 4294967168 }
  0x36   :  { %282 = dma.done.wait [#allocation9], 128  }
  0x37   :  { %283 = vsyncadd [#allocation9], 4294967168 }
  0x38   :  { %157 = vsyncpa [#allocation3], 1 }
  0x39   :  { %158 = vsyncpa [#allocation6], 1 }
  0x3a   :  { %159 = vsyncpa [#allocation4], 1 }
  0x3b   :  { %160 = vsyncpa [#allocation9], 1 }

</bundles_post_ra>
